<compile_context>
chip_gen: v7x
topology: tpu7x:2x2x1
jax: 0.10.0
libtpu: 0.0.40
codegen_flags: <defaults>
</compile_context>

<pallas_src>
import functools

import jax
import jax.numpy as jnp
from jax.experimental import pallas as pl
from jax.experimental.pallas import tpu as pltpu


def _group_sum(v, G, D):
    """v: [rows, G*D].  Returns [rows, G*D] where every position g*D + d holds
    sum_{g'} v[:, g'*D + d] (i.e. the per-group sum, already broadcast back to
    every group slot).  Uses a cyclic roll-and-add tree when G is a power of
    two, otherwise a short roll chain.  Rolls run on the XLU slot."""
    L = G * D
    if G & (G - 1) == 0:
        acc = v
        shift = D
        while shift < L:
            acc = acc + pltpu.roll(acc, shift, axis=1)
            shift *= 2
        return acc
    acc = v
    for g in range(1, G):
        acc = acc + pltpu.roll(v, g * D, axis=1)
    return acc


def _group_norm_kernel(x_ref, o_ref, *, G, D):
    # Block: [1, tc, G*D]; normalization is over the G groups packed in lanes.
    x = x_ref[0]                                   # [tc, G*D], lane-dense
    inv_g = 1.0 / G
    mean = _group_sum(x, G, D) * inv_g             # broadcast per-(c, d) mean
    xc = x - mean
    var = _group_sum(xc * xc, G, D) * inv_g        # biased var (unbiased=False)
    y = xc * jax.lax.rsqrt(var)                    # (x - mean) / sqrt(var)
    # torch zeroes every NaN in the output (0/0 for constant groups AND NaNs
    # propagated from NaN inputs) -> keep the exact-semantics scrub.
    y = jnp.where(jnp.isnan(y), 0.0, y)
    o_ref[0] = y


def _pick_c_tile(C, L, itemsize, budget_bytes=8 << 20):
    """Largest C-tile whose ~4 resident copies (double-buffered in + out) fit
    in `budget_bytes`; prefers multiples of 8 that divide C (8-sublane rule),
    and keeps real-size workloads to many grid steps per core."""
    if 4 * C * L * itemsize <= budget_bytes:
        return C
    cap = max(8, (budget_bytes // (4 * L * itemsize)) // 8 * 8)
    for t in range(min(cap, C) // 8 * 8, 7, -8):
        if C % t == 0:
            return t
    return 8


def group_norm(x):
    """x: [B, C, G, D] -> same shape, normalized over dim=2 (G), NaNs -> 0."""
    B, C, G, D = x.shape
    L = G * D
    x2 = x.reshape(B, C, L)                        # contiguous -> free
    tc = _pick_c_tile(C, L, x.dtype.itemsize)
    grid = (B, pl.cdiv(C, tc))
    out = pl.pallas_call(
        functools.partial(_group_norm_kernel, G=G, D=D),
        out_shape=jax.ShapeDtypeStruct((B, C, L), x.dtype),
        grid=grid,
        in_specs=[pl.BlockSpec((1, tc, L), lambda b, c: (b, c, 0))],
        out_specs=pl.BlockSpec((1, tc, L), lambda b, c: (b, c, 0)),
        compiler_params=pltpu.CompilerParams(
            dimension_semantics=("parallel", "parallel")),
    )(x2)
    return out.reshape(B, C, G, D)


def _reference(x):
    mean = jnp.mean(x, axis=2, keepdims=True)
    xc = x - mean
    var = jnp.mean(xc * xc, axis=2, keepdims=True)
    y = xc / jnp.sqrt(var)
    return jnp.where(jnp.isnan(y), 0.0, y)


if __name__ == "__main__":
    B, C, G, D = 2, 4, 16, 16
    key = jax.random.PRNGKey(0)
    x = jax.random.normal(key, (B, C, G, D), jnp.float32)
    # Exercise the NaN-replacement path: a constant slice along dim=2 gives
    # var == 0, so the normalized values are 0/0 = NaN -> must become 0.
    x = x.at[0, 0, :, 0].set(3.0)

    out = jax.block_until_ready(group_norm(x))
    assert out.shape == (B, C, G, D)

    ref = jax.block_until_ready(_reference(x))
    err = float(jnp.max(jnp.abs(out - ref)))
    assert err < 1e-5, f"max abs error too large: {err}"
    # The degenerate (constant) group must have been scrubbed to exactly 0.
    assert bool(jnp.all(out[0, 0, :, 0] == 0.0))

    print("KERNEL_OK")
</pallas_src>

<mosaic_0001>
module attributes {stable_mosaic.version = 11 : i64} {
  func.func @_group_norm_kernel(%arg0: i32, %arg1: i32, %arg2: memref<1x4x256xf32, #tpu.memory_space<vmem>>, %arg3: memref<1x4x256xf32, #tpu.memory_space<vmem>>) attributes {dimension_semantics = [#tpu.dimension_semantics<parallel>, #tpu.dimension_semantics<parallel>], iteration_bounds = array<i64: 2, 1>, scalar_prefetch = 0 : i64, scratch_operands = 0 : i64, tpu.core_type = #tpu.core_type<tc>, window_params = [{transform_indices = @transform_0, window_bounds = array<i64: 1, 4, 256>}, {transform_indices = @transform_1, window_bounds = array<i64: 1, 4, 256>}]} {
    %c0 = arith.constant 0 : index
    %c0_0 = arith.constant 0 : index
    %c0_1 = arith.constant 0 : index
    %0 = vector.load %arg2[%c0, %c0_0, %c0_1] : memref<1x4x256xf32, #tpu.memory_space<vmem>>, vector<1x4x256xf32>
    %1 = vector.shape_cast %0 : vector<1x4x256xf32> to vector<4x256xf32>
    %c16_i32 = arith.constant 16 : i32
    %2 = tpu.dynamic_rotate %1 by %c16_i32 dim 1 : vector<4x256xf32>, i32 -> vector<4x256xf32>
    %3 = arith.addf %1, %2 : vector<4x256xf32>
    %c32_i32 = arith.constant 32 : i32
    %4 = tpu.dynamic_rotate %3 by %c32_i32 dim 1 : vector<4x256xf32>, i32 -> vector<4x256xf32>
    %5 = arith.addf %3, %4 : vector<4x256xf32>
    %c64_i32 = arith.constant 64 : i32
    %6 = tpu.dynamic_rotate %5 by %c64_i32 dim 1 : vector<4x256xf32>, i32 -> vector<4x256xf32>
    %7 = arith.addf %5, %6 : vector<4x256xf32>
    %c128_i32 = arith.constant 128 : i32
    %8 = tpu.dynamic_rotate %7 by %c128_i32 dim 1 : vector<4x256xf32>, i32 -> vector<4x256xf32>
    %9 = arith.addf %7, %8 : vector<4x256xf32>
    %cst = arith.constant 6.250000e-02 : f32
    %10 = vector.broadcast %cst : f32 to vector<4x256xf32>
    %11 = arith.mulf %9, %10 : vector<4x256xf32>
    %12 = arith.subf %1, %11 : vector<4x256xf32>
    %13 = arith.mulf %12, %12 : vector<4x256xf32>
    %c16_i32_2 = arith.constant 16 : i32
    %14 = tpu.dynamic_rotate %13 by %c16_i32_2 dim 1 : vector<4x256xf32>, i32 -> vector<4x256xf32>
    %15 = arith.addf %13, %14 : vector<4x256xf32>
    %c32_i32_3 = arith.constant 32 : i32
    %16 = tpu.dynamic_rotate %15 by %c32_i32_3 dim 1 : vector<4x256xf32>, i32 -> vector<4x256xf32>
    %17 = arith.addf %15, %16 : vector<4x256xf32>
    %c64_i32_4 = arith.constant 64 : i32
    %18 = tpu.dynamic_rotate %17 by %c64_i32_4 dim 1 : vector<4x256xf32>, i32 -> vector<4x256xf32>
    %19 = arith.addf %17, %18 : vector<4x256xf32>
    %c128_i32_5 = arith.constant 128 : i32
    %20 = tpu.dynamic_rotate %19 by %c128_i32_5 dim 1 : vector<4x256xf32>, i32 -> vector<4x256xf32>
    %21 = arith.addf %19, %20 : vector<4x256xf32>
    %cst_6 = arith.constant 6.250000e-02 : f32
    %22 = vector.broadcast %cst_6 : f32 to vector<4x256xf32>
    %23 = arith.mulf %21, %22 : vector<4x256xf32>
    %24 = math.rsqrt %23 : vector<4x256xf32>
    %25 = arith.mulf %12, %24 : vector<4x256xf32>
    %26 = arith.cmpf one, %25, %25 : vector<4x256xf32>
    %cst_7 = arith.constant 0.000000e+00 : f32
    %27 = vector.broadcast %cst_7 : f32 to vector<4x256xf32>
    %28 = arith.select %26, %27, %25 : vector<4x256xi1>, vector<4x256xf32>
    %c0_8 = arith.constant 0 : index
    %c0_9 = arith.constant 0 : index
    %c0_10 = arith.constant 0 : index
    %29 = vector.load %arg3[%c0_8, %c0_9, %c0_10] : memref<1x4x256xf32, #tpu.memory_space<vmem>>, vector<1x4x256xf32>
    %30 = vector.shape_cast %29 : vector<1x4x256xf32> to vector<4x256xf32>
    %31 = vector.shape_cast %28 : vector<4x256xf32> to vector<1x4x256xf32>
    tpu.vector_store %arg3[%c0_8, %c0_9, %c0_10], %31 {strides = array<i32>} : memref<1x4x256xf32, #tpu.memory_space<vmem>>, vector<1x4x256xf32>,
    return
  }
  func.func @transform_0(%arg0: i32, %arg1: i32) -> (i32, i32, i32) {
    %c0_i32 = arith.constant 0 : i32
    %c0_i32_0 = arith.constant 0 : i32
    return %arg0, %arg1, %c0_i32 : i32, i32, i32
  }
  func.func @transform_1(%arg0: i32, %arg1: i32) -> (i32, i32, i32) {
    %c0_i32 = arith.constant 0 : i32
    %c0_i32_0 = arith.constant 0 : i32
    return %arg0, %arg1, %c0_i32 : i32, i32, i32
  }
}

</mosaic_0001>

<bundles_post_ra>
// kernel: tpu_custom_call.1
= control target key start
LH: loop header
LB: loop body
LE: loop exit
PB: predicated region body
PF: predicated region fallthrough
CT: control target
= control target key end

     0   :  { %6 = vsyncpa [#allocation3], 0  ;;  %s775_s0 = inlined_call_operand.hbm [shape: f32[2,4,256], index: 0, kind: input, shape index: {}]   ;;  %s776_s1 = inlined_call_operand.hbm [shape: f32[2,4,256], index: 1, kind: output, shape index: {}]  }
   0x1   :  { %8 = vsyncpa [#allocation3 + $0x1], 0 }
   0x2   :  { %9 = vsyncpa [#allocation4], 0 }
   0x3   :  { %11 = vsyncpa [#allocation4 + $0x1], 0  ;;  %s575_s6 = smov 0   ;;  %s577_s7 = smov 0  }
   0x4   :  { %s579_s8 = smov 0   ;;  %s581_s9 = smov 0  }
   0x5   :  { %s583_s10 = smov 0   ;;  %s585_s11 = smov 0  }
   0x6 LB: > { %s361_s12 = sadd.s32 4294967295, %s558_s11   ;;  %s362_s13 = sadd.s32 4294967294, %s558_s11   ;;  %s558_s11 = sphi %s585_s11, %s17_s11   ;;  %s554_s10 = sphi %s583_s10, %s792_s10   ;;  %s550_s9 = sphi %s581_s9, %s791_s9   ;;  %s546_s8 = sphi %s579_s8, %s790_s8   ;;  %s542_s7 = sphi %s577_s7, %s789_s7   ;;  %s538_s6 = sphi %s575_s6, %s788_s6  }
   0x7   : > { %s29_s14 = sadd.s32 1, %s554_s10  ;;  %s38_s15 = sadd.s32 1, %s546_s8 }
   0x8   : > { %p31_p0 = scmp.ge.s32.totalorder %s29_s14, 2  ;;  %p45_p1 = scmp.ne.s32.totalorder %s546_s8, %s542_s7 }
   0x9   : > { %p46_p2 = scmp.eq.s32.totalorder %s558_s11, 0  ;;  %p51_p3 = scmp.ne.s32.totalorder %s542_s7, %s538_s6 }
   0xa   : > { %s794_s14 = smov (%p31_p0, %s29_s14), 0  ;;  %p52_p5 = scmp.eq.s32.totalorder %s361_s12, 0 }
   0xb   : > { %p616_p4 = por %p46_p2, %p45_p1  ;;  %s33_s17 = ssub.s32 %s554_s10, %s794_s14 }
   0xc   : > { %p77_p6 = scmp.eq.s32.totalorder %s361_s12, 1  ;;  %p36_p7 = scmp.eq.s32.totalorder %s33_s17, 0 }
   0xd   : > { %p622_p8 = por %p52_p5, %p51_p3  ;;  %p83_p10 = scmp.eq.s32.totalorder %s362_s13, 1 }
   0xe   : > { %p626_p9 = por %p77_p6, %p45_p1  ;;  %p390_p13 = scmp.lt.s32.totalorder %s558_s11, 2 }
   0xf   : > { %s631_s20 = scalar_select %p36_p7, %s546_s8, %s38_s15  }
  0x10   : > { %s780_s19 = scalar_select %p626_p9, 1, 0 }
  0x11   : > { %p633_p11 = por %p83_p10, %p51_p3  ;;  %s103_s22 = sand.u32 1, %s546_s8  }
  0x12   : > { %s365_s23 = sshll.u32 %s103_s22, 3  ;;  %s376_s24 = sshll.u32 %s554_s10, 7 }
  0x13   : > { %s781_s21 = scalar_select %p633_p11, 1, 0 }
  0x14   : > { %s644_s27 = scalar_lea.hbm %s775_s0, %s376_s24  ;;  %s107_s28 = scalar_lea.vmem [#allocation2], %s365_s23 }
  0x15   : > { %s117_s29 = sshll.u32 %s107_s28, 4  ;;  %p650_p0 = pnand %p390_p13, %p616_p4  ;;  %s646_s29 = int_to_ptr.vmem [resolvable:$true] %s117_s29 }
  0x16   : > { %s104_s2 = scalar_lea.sflag [#allocation3], %s103_s22  ;;  %s446_s3 = scalar_lea.hbm %s644_s27, 128 }
  0x17   : > { %p447_p3 = scmp.ne.s32.totalorder %s644_s27, %s446_s3  ;;  %p448_p5 = pneg %p650_p0 }
  0x18   : > { %s451_s12 = scalar_lea.hbm %s775_s0, 256  ;;  %p452_p4 = scmp.lt.u32.totalorder %s644_s27, %s775_s0 }
  0x19   : > { %p449_p6 = pnand %p448_p5, %p447_p3  ;;  %p453_p10 = scmp.lt.u32.totalorder %s451_s12, %s446_s3 }
  0x1a   : > { %p455_p12 = scmp.lt.u32.totalorder %s446_s3, %s644_s27 }
  0x1b   : > { %p450_p7 = pneg %p449_p6  ;;  %p454_p13 = por %p453_p10, %p452_p4 }
  0x1d   : > { %p456_p1 = por %p455_p12, %p454_p13 }
  0x1f   : > { %p457_p2 = pnand %p456_p1, %p450_p7 }
  0x21   : > { %460 = shalt.err (!%p457_p2)
}
  0x22   : > { %s461_s16 = scalar_lea.vmem %s646_s29, 128  ;;  %s560_s17 = smov [#allocation2]  }
  0x23   : > { %p462_p3 = scmp.ne.s32.totalorder %s646_s29, %s461_s16  ;;  %s466_s22 = sshll.u32 %s560_s17, 4  ;;  %s467_s22 = int_to_ptr.vmem [resolvable:$false] %s466_s22 }
  0x24   : > { %s468_s23 = scalar_lea.vmem %s467_s22, 256  ;;  %p469_p9 = scmp.lt.s32.totalorder %s646_s29, %s467_s22 }
  0x25   : > { %p464_p6 = pnand %p462_p3, %p448_p5  ;;  %p470_p4 = scmp.lt.s32.totalorder %s468_s23, %s461_s16 }
  0x27   : > { %p465_p11 = pneg %p464_p6  ;;  %p471_p10 = por %p470_p4, %p469_p9 }
  0x29   : > { %p472_p12 = pnand %p471_p10, %p465_p11 }
  0x2b   : > { %475 = shalt.err (!%p472_p12)
}
  0x2c   : > { %385 = dma.hbm_to_vmem [thread:$0]  (!%p650_p0), %s644_s27, 128, %s646_s29, %s104_s2  }
  0x2d   : > { %p783_p1 = scmp.lt.s32.totalorder %s558_s11, 3  ;;  %p784_p2 = scmp.ge.s32.totalorder %s558_s11, 1 }
  0x2f   : > { %p123_p5 = pnand %p784_p2, %p783_p1 }
  0x30   : > { %s686_s24 = sand.u32 (!%p123_p5), 1, %s542_s7  }
  0x31   : > { %126 = sbr.rel (%p123_p5) target bundleno = 843 (0x34b), region = 24  ;;  %s369_s25 = sshll.u32 (!%p123_p5), %s686_s24, 3 }
  0x32   : > { %s129_s26 = scalar_lea.sflag (!%p123_p5), [#allocation3], %s686_s24  ;;  %s132_s28 = scalar_lea.vmem (!%p123_p5), [#allocation2], %s369_s25 }
  0x38   : > { %529 = dma.done.wait (%p622_p8), %s129_s26, 128  }
  0x39   : > { %531 = vsyncadd (%p622_p8), %s129_s26, 4294967168  ;;  %v151_v0 = vld [vmem:[%s132_s28] sm:$0xff]  ;;  %s561_s27 = smov 16   ;;  %v159_v2 = vlaneseq  ;;  %s562_s18 = smov 32  }
  0x3a   : > { %155 = vrot.lane.b32.xlu0 %v151_v0, %s561_s27  ;;  %v153_v1 = vcombine.high %v151_v0, %v151_v0  ;;  %s563_s29 = smov 64   ;;  %s377_s30 = sshll.u32 %s550_s9, 7 }
  0x3b   : > { %v160_v3 = vand.u32 127, %v159_v2  ;;  %s150_s2 = scalar_lea.vmem [#allocation5], %s369_s25  ;;  %s726_s12 = scalar_lea.hbm %s776_s1, %s377_s30 }
  0x3c   : > { %s277_s3 = sshll.u32 %s150_s2, 4  ;;  %s261_s13 = scalar_lea.sflag [#allocation4], %s686_s24  ;;  %s728_s3 = int_to_ptr.vmem [resolvable:$true] %s277_s3 }
  0x3d   : > { %vm161_vm0 = vcmp.lt.s32.totalorder %v160_v3, 16  ;;  %vm176_vm1 = vcmp.lt.s32.totalorder %v160_v3, 32  ;;  %vm191_vm2 = vcmp.lt.s32.totalorder %v160_v3, 64  ;;  %s476_s15 = scalar_lea.vmem %s728_s3, 128  ;;  %p785_p9 = scmp.ne.s32.totalorder %s780_s19, 0 }
  0x3e   : > { %157 = vrot.lane.b32.xlu0 %v153_v1, %s561_s27  ;;  %p477_p8 = scmp.ne.s32.totalorder %s728_s3, %s476_s15  ;;  %s564_s9 = smov [#allocation5]  }
  0x3f   : > { %s480_s16 = sshll.u32 %s564_s9, 4  ;;  %s481_s16 = int_to_ptr.vmem [resolvable:$false] %s480_s16 }
  0x40   : > { %p478_p11 = pnand %p477_p8, %p785_p9  ;;  %s482_s17 = scalar_lea.vmem %s481_s16, 256 }
  0x41   : > { %p483_p7 = scmp.lt.s32.totalorder %s728_s3, %s481_s16  ;;  %p484_p13 = scmp.lt.s32.totalorder %s482_s17, %s476_s15 }
  0x42   : > { %p479_p0 = pneg %p478_p11 }
  0x43   : > { %p485_p3 = por %p484_p13, %p483_p7 }
  0x45   : > { %p486_p6 = pnand %p485_p3, %p479_p0 }
  0xac   : > { %v156_v4 = vpop.permute.xlu0 %155 }
  0xb0   : > { %v158_v5 = vpop.permute.xlu0 %157 }
  0xb1   : > { %v162_v6 = vsel %vm161_vm0, %v156_v4, %v158_v5  ;;  %v163_v7 = vsel %vm161_vm0, %v158_v5, %v156_v4 }
  0xb2   : > { %v166_v8 = vcombine.low %v163_v7, %v162_v6 }
  0xb4   : > { %v168_v9 = vadd.f32 %v166_v8, %v151_v0 }
  0xb6   : > { %172 = vrot.lane.b32.xlu1 %v168_v9, %s562_s18  ;;  %v170_v10 = vcombine.high %v168_v9, %v168_v9 }
  0xba   : > { %174 = vrot.lane.b32.xlu1 %v170_v10, %s562_s18 }
 0x128   : > { %v173_v11 = vpop.permute.xlu1 %172 }
 0x12c   : > { %v175_v12 = vpop.permute.xlu1 %174 }
 0x12d   : > { %v177_v13 = vsel %vm176_vm1, %v173_v11, %v175_v12  ;;  %v178_v14 = vsel %vm176_vm1, %v175_v12, %v173_v11 }
 0x12e   : > { %v181_v15 = vcombine.low %v178_v14, %v177_v13 }
 0x130   : > { %v183_v16 = vadd.f32 %v181_v15, %v168_v9 }
 0x132   : > { %187 = vrot.lane.b32.xlu0 %v183_v16, %s563_s29  ;;  %v185_v17 = vcombine.high %v183_v16, %v183_v16 }
 0x134   : > { %189 = vrot.lane.b32.xlu1 %v185_v17, %s563_s29 }
 0x1a4   : > { %v188_v18 = vpop.permute.xlu0 %187 }
 0x1a6   : > { %v190_v19 = vpop.permute.xlu1 %189 }
 0x1a7   : > { %v192_v20 = vsel %vm191_vm2, %v188_v18, %v190_v19  ;;  %v193_v21 = vsel %vm191_vm2, %v190_v19, %v188_v18 }
 0x1a8   : > { %v196_v22 = vcombine.low %v193_v21, %v192_v20 }
 0x1aa   : > { %v198_v23 = vadd.f32 %v196_v22, %v183_v16 }
 0x1ac   : > { %v200_v24 = vcombine.high %v198_v23, %v198_v23 }
 0x1ae   : > { %v201_v25 = vcombine.low %v200_v24, %v198_v23 }
 0x1b0   : > { %v203_v26 = vadd.f32 %v201_v25, %v198_v23 }
 0x1b2   : > { %v204_v27 = vmul.f32 0.0625, %v203_v26 }
 0x1b4   : > { %v205_v28 = vsub.f32 %v151_v0, %v204_v27 }
 0x1b6   : > { %v206_v29 = vmul.f32 %v205_v28, %v205_v28 }
 0x1b8   : > { %210 = vrot.lane.b32.xlu0 %v206_v29, %s561_s27  ;;  %v208_v30 = vcombine.high %v206_v29, %v206_v29 }
 0x1ba   : > { %212 = vrot.lane.b32.xlu1 %v208_v30, %s561_s27 }
 0x22a   : > { %v211_v31 = vpop.permute.xlu0 %210 }
 0x22c   : > { %v213_v32 = vpop.permute.xlu1 %212 }
 0x22d   : > { %v214_v33 = vsel %vm161_vm0, %v211_v31, %v213_v32  ;;  %v215_v34 = vsel %vm161_vm0, %v213_v32, %v211_v31 }
 0x22e   : > { %v218_v35 = vcombine.low %v215_v34, %v214_v33 }
 0x230   : > { %v220_v36 = vadd.f32 %v218_v35, %v206_v29 }
 0x232   : > { %224 = vrot.lane.b32.xlu0 %v220_v36, %s562_s18  ;;  %v222_v37 = vcombine.high %v220_v36, %v220_v36 }
 0x234   : > { %226 = vrot.lane.b32.xlu1 %v222_v37, %s562_s18 }
 0x2a4   : > { %v225_v38 = vpop.permute.xlu0 %224 }
 0x2a6   : > { %v227_v39 = vpop.permute.xlu1 %226 }
 0x2a7   : > { %v228_v40 = vsel %vm176_vm1, %v225_v38, %v227_v39  ;;  %v229_v41 = vsel %vm176_vm1, %v227_v39, %v225_v38 }
 0x2a8   : > { %v232_v42 = vcombine.low %v229_v41, %v228_v40 }
 0x2aa   : > { %v234_v43 = vadd.f32 %v232_v42, %v220_v36 }
 0x2ac   : > { %238 = vrot.lane.b32.xlu0 %v234_v43, %s563_s29  ;;  %v236_v44 = vcombine.high %v234_v43, %v234_v43 }
 0x2ae   : > { %240 = vrot.lane.b32.xlu1 %v236_v44, %s563_s29 }
 0x31e   : > { %v239_v45 = vpop.permute.xlu0 %238 }
 0x320   : > { %v241_v46 = vpop.permute.xlu1 %240 }
 0x321   : > { %v242_v47 = vsel %vm191_vm2, %v239_v45, %v241_v46  ;;  %v243_v48 = vsel %vm191_vm2, %v241_v46, %v239_v45 }
 0x322   : > { %v246_v49 = vcombine.low %v243_v48, %v242_v47 }
 0x324   : > { %v248_v50 = vadd.f32 %v246_v49, %v234_v43 }
 0x326   : > { %v250_v51 = vcombine.high %v248_v50, %v248_v50 }
 0x328   : > { %v251_v52 = vcombine.low %v250_v51, %v248_v50 }
 0x32a   : > { %v253_v53 = vadd.f32 %v251_v52, %v248_v50 }
 0x32c   : > { %v254_v54 = vmul.f32 0.0625, %v253_v53 }
 0x32e   : > { %444 = vrsqrt.f32 %v254_v54 }
 0x338   : > { %v445_v55 = vpop.eup %444 }
 0x339   : > { %v256_v56 = vmul.f32 %v445_v55, %v205_v28 }
 0x33b   : > { %vm257_vm3 = vcmp.ne.f32.partialorder %v256_v56, %v256_v56 }
 0x33c   : > { %v258_v57 = vsel %vm257_vm3, 0.0, %v256_v56 }
 0x33d   : > { %259 = vst [vmem:[%s150_s2] sm:$0xff] %v258_v57 }
 0x33e   : > { %489 = shalt.err (!%p486_p6)
}
 0x33f   : > { %s490_s22 = scalar_lea.hbm %s726_s12, 128  ;;  %s494_s25 = scalar_lea.hbm %s776_s1, 256 }
 0x340   : > { %p491_p4 = scmp.ne.s32.totalorder %s726_s12, %s490_s22  ;;  %p495_p1 = scmp.lt.u32.totalorder %s726_s12, %s776_s1 }
 0x341   : > { %p496_p2 = scmp.lt.u32.totalorder %s494_s25, %s490_s22  ;;  %p498_p8 = scmp.lt.u32.totalorder %s490_s22, %s726_s12 }
 0x342   : > { %p492_p10 = pnand %p491_p4, %p785_p9 }
 0x343   : > { %p497_p5 = por %p496_p2, %p495_p1 }
 0x344   : > { %p493_p12 = pneg %p492_p10 }
 0x345   : > { %p499_p11 = por %p498_p8, %p497_p5 }
 0x347   : > { %p500_p0 = pnand %p499_p11, %p493_p12 }
 0x349   : > { %503 = shalt.err (!%p500_p0)
}
 0x34a   : > { %380 = dma.vmem_to_hbm [thread:$0]  (%p785_p9), %s728_s3, 128, %s726_s12, %s261_s13  }
 0x34b PF: > { %s289_s27 = sand.u32 1, %s538_s6   ;;  %p786_p7 = scmp.ne.s32.totalorder %s781_s21, 0 }
 0x34c   : > { %p787_p13 = scmp.ge.s32.totalorder %s558_s11, 2  ;;  %s290_s18 = scalar_lea.sflag [#allocation4], %s289_s27 }
 0x34e   : > { %p387_p3 = pnand %p787_p13, %p786_p7 }
 0x350   : > { %533 = dma.done.wait (!%p387_p3), %s290_s18, 128  }
 0x351   : > { %535 = vsyncadd (!%p387_p3), %s290_s18, 4294967168  ;;  %s17_s11 = sadd.s32 1, %s558_s11   ;;  %s788_s6 = smov %s542_s7 }
 0x352   : > { %p14_p6 = scmp.ge.s32.totalorder %s17_s11, 4   ;;  %s789_s7 = smov %s546_s8 }
 0x353   : > { %s790_s8 = smov %s631_s20  ;;  %s791_s9 = smov %s554_s10 }
 0x354   : > { %s792_s10 = smov %s794_s14  ;;  %16 = sbr.rel (!%p14_p6) target bundleno = 6 (0x6), region = 69 }
 0x35b   :  { %295 = vsyncpa [#allocation3], 1 }
 0x35c   :  { %297 = vsyncpa [#allocation3 + $0x1], 1 }
 0x35d   :  { %298 = vsyncpa [#allocation4], 1 }
 0x35e   :  { %300 = vsyncpa [#allocation4 + $0x1], 1 }

</bundles_post_ra>
